<compile_context>
chip_gen: v7x
topology: tpu7x:2x2x1
jax: 0.10.0
libtpu: 0.0.40
codegen_flags: <defaults>
</compile_context>

<pallas_src>
import math
import functools

import jax
import jax.numpy as jnp
from jax.experimental import pallas as pl
from jax.experimental.pallas import tpu as pltpu


def _layernorm(y, gamma, beta, eps=1e-5):
    mu = jnp.mean(y, axis=-1, keepdims=True)
    var = jnp.mean((y - mu) * (y - mu), axis=-1, keepdims=True)
    return (y - mu) * jax.lax.rsqrt(var + eps) * gamma + beta


def encoder_layer_kernel(x_ref, wqkv_ref, bqkv_ref, wo_ref, bo_ref,
                         g1_ref, be1_ref, w1_ref, b1_ref, w2_ref, b2_ref,
                         g2_ref, be2_ref, o_ref, *, n_heads, seq_len):
    # x_ref block: (Bb*S, D) rows of Bb consecutive batch elements.
    R, D = x_ref.shape
    S = seq_len
    Bb = R // S
    H = n_heads
    dh = D // H

    x = x_ref[...].astype(jnp.float32)                             # (R, D)

    # ---- packed QKV projection: one (R, D) x (D, 3D) GEMM.  The 1/sqrt(dh) query scale is
    #      folded into the Q columns of wqkv/bqkv at prep time, so no extra VPU multiply. ----
    qkv = jnp.dot(x, wqkv_ref[...], preferred_element_type=jnp.float32) + bqkv_ref[...]
    q = qkv[:, 0 * D:1 * D].reshape(Bb, S, D)                      # major-axis reshape: free
    k = qkv[:, 1 * D:2 * D].reshape(Bb, S, D)
    v = qkv[:, 2 * D:3 * D].reshape(Bb, S, D)

    # ---- scaled dot-product attention, batched over the batch axis on the MXU.
    #      Heads stay on the lane axis: each head is one static lane slice (H slices total,
    #      no Bb unrolling) fed to a single-leading-batch 3-D einsum; head contexts are
    #      reassembled with one lane concat so the output projection runs as a single
    #      full-width GEMM. ----
    # TODO(synk): for long S, tile over key blocks with an online-softmax accumulator instead
    # of materializing the per-head (Bb, S, S) f32 score tensor.
    head_ctx = []
    for h in range(H):
        cols = slice(h * dh, (h + 1) * dh)
        qh, kh, vh = q[:, :, cols], k[:, :, cols], v[:, :, cols]   # (Bb, S, dh)
        s = jnp.einsum('bqd,bkd->bqk', qh, kh,
                       preferred_element_type=jnp.float32)         # (Bb, S, S)
        s = s - jnp.max(s, axis=-1, keepdims=True)
        p = jnp.exp(s)
        # TODO(synk): pl.reciprocal(..., approx=True) would move this divide to the EUP slot.
        p = p / jnp.sum(p, axis=-1, keepdims=True)
        head_ctx.append(jnp.einsum('bqk,bkd->bqd', p, vh,
                                   preferred_element_type=jnp.float32))   # (Bb, S, dh)
    ctx = jnp.concatenate(head_ctx, axis=-1).reshape(R, D)         # heads back on lanes

    # ---- output projection: ONE (R, D) x (D, D) GEMM (wo pre-transposed host-side) ----
    a = jnp.dot(ctx, wo_ref[...], preferred_element_type=jnp.float32) + bo_ref[...]

    # ---- residual + LayerNorm 1 (post-norm) ----
    x1 = _layernorm(x + a, g1_ref[...], be1_ref[...])

    # ---- feed-forward: (R,D)x(D,F) -> ReLU -> (R,F)x(F,D)  (weights pre-transposed) ----
    # TODO(synk): for production d_ff on v7x, add a d_ff-tiled 'arbitrary' grid axis with an
    # f32 VMEM accumulator so h1 / w1 / w2 never need to be resident simultaneously.
    h1 = jnp.dot(x1, w1_ref[...], preferred_element_type=jnp.float32) + b1_ref[...]
    h1 = jnp.maximum(h1, 0.0)
    f = jnp.dot(h1, w2_ref[...], preferred_element_type=jnp.float32) + b2_ref[...]

    # ---- residual + LayerNorm 2 (post-norm) ----
    o_ref[...] = _layernorm(x1 + f, g2_ref[...], be2_ref[...]).astype(o_ref.dtype)


def _tpu_vmem_capacity_bytes(default=128 << 20):
    """Best-effort physical-VMEM query (v5e/v6e: 128 MiB, v7x: 64 MiB)."""
    try:
        return int(pltpu.get_tpu_info().vmem_capacity_bytes)
    except Exception:
        return default


def _pick_block_batch(B, S, target_rows, min_grid=4):
    """Largest batch block whose row slab stays under target_rows while keeping >= min_grid
    grid steps (never collapses to grid=(1,) when avoidable, so the x-slab DMA pipelines and
    a parallel batch axis can shard across TensorCores)."""
    divisors = [d for d in range(1, B + 1) if B % d == 0]
    valid = [d for d in divisors if (d * S) % 8 == 0 or d == B]   # (8,128) block constraint
    want_grid = min(min_grid, B)
    for bb in sorted(valid, reverse=True):
        if bb * S <= target_rows and B // bb >= want_grid:
            return bb
    # Nothing fits the row target with enough grid steps: maximize grid steps instead.
    return min(valid) if valid else B


def _vmem_limit_bytes(rows, S, D, d_ff, H, vmem_cap, itemsize=4):
    Bb = max(rows // S, 1)
    weights = (D * 3 * D + 3 * D) + (D * D + D) + (D * d_ff + d_ff) + (d_ff * D + D) + 4 * D
    acts = rows * (6 * D + d_ff) + Bb * H * S * (2 * S)
    est = (2 * weights + 3 * acts) * itemsize + (4 << 20)
    # Never request all of physical VMEM: leave >= 1/8 for compiler scratch / semaphores /
    # double-buffered x/out slabs.  On 128 MiB parts this allows limits well above 64 MiB.
    ceiling = (vmem_cap // 8) * 7
    return int(min(max(est, 32 << 20), ceiling))


def prepare_encoder_params(params, n_heads, weights_dtype=jnp.float32):
    """One-time host-side re-layout into kernel-friendly form (call at parameter init, NOT
    per forward, so the transposes / scale fold / optional bf16 cast never become per-step
    HBM traffic).  weights_dtype=jnp.bfloat16 halves weight VMEM/DMA on v6e/v7x; dots still
    accumulate in f32 via preferred_element_type."""
    D = params["wo"].shape[0]
    dh = D // n_heads
    scale = 1.0 / math.sqrt(dh)

    # Fold the 1/sqrt(dh) query scale into the Q third of the packed projection.
    col_scale = jnp.concatenate([jnp.full((D,), scale, jnp.float32),
                                 jnp.ones((2 * D,), jnp.float32)])
    wqkv_t = jnp.transpose(params["wqkv"]) * col_scale[None, :]     # (D, 3D)
    bqkv = params["bqkv"] * col_scale[None, :]                      # (1, 3D)

    return {
        "wqkv_t": wqkv_t.astype(weights_dtype),
        "bqkv": bqkv.astype(jnp.float32),
        "wo_t": jnp.transpose(params["wo"]).astype(weights_dtype),  # (D, D)
        "bo": params["bo"].astype(jnp.float32),
        "g1": params["g1"].astype(jnp.float32),
        "be1": params["be1"].astype(jnp.float32),
        "w1_t": jnp.transpose(params["w1"]).astype(weights_dtype),  # (D, d_ff)
        "b1": params["b1"].astype(jnp.float32),
        "w2_t": jnp.transpose(params["w2"]).astype(weights_dtype),  # (d_ff, D)
        "b2": params["b2"].astype(jnp.float32),
        "g2": params["g2"].astype(jnp.float32),
        "be2": params["be2"].astype(jnp.float32),
    }


def transformer_encoder_layer(src, prep, n_heads):
    """src: (B, S, D) float32.  prep: prepare_encoder_params output.  Returns (B, S, D)."""
    B, S, D = src.shape
    d_ff = prep["w1_t"].shape[1]

    vmem_cap = _tpu_vmem_capacity_bytes()
    # Bigger row slabs on 128 MiB parts (v5e/v6e), modest ones on v7x's 64 MiB.
    target_rows = 1024 if vmem_cap >= (96 << 20) else 256
    Bb = _pick_block_batch(B, S, target_rows=target_rows)
    grid = (B // Bb,)
    rows = Bb * S

    x2d = src.reshape(B * S, D)
    # TODO(synk): if a sub-128 D is a real deployment config, present lane-dense (rows/4, 128)
    # slabs at the pallas_call boundary to avoid masked partial stores; moot for D >= 128.

    # Grid-invariant weight blocks: single-buffer them on 64 MiB (v7x-sized) VMEM to halve
    # their residency; on 128 MiB parts the default double-buffering is harmless.
    single_buffer = (48 << 20) <= vmem_cap < (96 << 20)

    def weight_spec(shape):
        kwargs = {"pipeline_mode": pl.Buffered(1)} if single_buffer else {}
        return pl.BlockSpec(shape, lambda i: (0,) * len(shape), **kwargs)

    kernel = functools.partial(encoder_layer_kernel, n_heads=n_heads, seq_len=S)

    out2d = pl.pallas_call(
        kernel,
        out_shape=jax.ShapeDtypeStruct((B * S, D), jnp.float32),
        grid_spec=pltpu.PrefetchScalarGridSpec(
            num_scalar_prefetch=0,
            grid=grid,
            in_specs=[
                pl.BlockSpec((rows, D), lambda i: (i, 0)),   # x rows (Bb batch elements)
                weight_spec(prep["wqkv_t"].shape),           # in_proj W^T (scale folded)
                weight_spec(prep["bqkv"].shape),             # in_proj bias (scale folded)
                weight_spec(prep["wo_t"].shape),             # out_proj W^T
                weight_spec(prep["bo"].shape),                # out_proj bias
                weight_spec(prep["g1"].shape),                # norm1 gamma
                weight_spec(prep["be1"].shape),               # norm1 beta
                weight_spec(prep["w1_t"].shape),              # ff linear1 W^T
                weight_spec(prep["b1"].shape),                # ff linear1 bias
                weight_spec(prep["w2_t"].shape),              # ff linear2 W^T
                weight_spec(prep["b2"].shape),                # ff linear2 bias
                weight_spec(prep["g2"].shape),                # norm2 gamma
                weight_spec(prep["be2"].shape),               # norm2 beta
            ],
            out_specs=pl.BlockSpec((rows, D), lambda i: (i, 0)),
        ),
        compiler_params=pltpu.CompilerParams(
            dimension_semantics=("parallel",),
            vmem_limit_bytes=_vmem_limit_bytes(rows, S, D, d_ff, n_heads, vmem_cap),
        ),
    )(x2d, prep["wqkv_t"], prep["bqkv"], prep["wo_t"], prep["bo"],
      prep["g1"], prep["be1"], prep["w1_t"], prep["b1"],
      prep["w2_t"], prep["b2"], prep["g2"], prep["be2"])

    return out2d.reshape(B, S, D)


def _reference(src, params, n_heads):
    """Pure-JAX reference reproducing the PyTorch forward (eval mode, no mask, post-norm)."""
    B, S, D = src.shape
    dh = D // n_heads
    wqkv, bqkv = params["wqkv"], params["bqkv"][0]
    qkv = src @ wqkv.T + bqkv
    q, k, v = qkv[..., :D], qkv[..., D:2 * D], qkv[..., 2 * D:]
    q = q.reshape(B, S, n_heads, dh).transpose(0, 2, 1, 3) / math.sqrt(dh)
    k = k.reshape(B, S, n_heads, dh).transpose(0, 2, 1, 3)
    v = v.reshape(B, S, n_heads, dh).transpose(0, 2, 1, 3)
    s = jnp.einsum("bhqd,bhkd->bhqk", q, k)
    p = jax.nn.softmax(s, axis=-1)
    a = jnp.einsum("bhqk,bhkd->bhqd", p, v).transpose(0, 2, 1, 3).reshape(B, S, D)
    a = a @ params["wo"].T + params["bo"][0]

    def ln(y, g, b, eps=1e-5):
        mu = jnp.mean(y, -1, keepdims=True)
        var = jnp.mean((y - mu) ** 2, -1, keepdims=True)
        return (y - mu) / jnp.sqrt(var + eps) * g[0] + b[0]

    x1 = ln(src + a, params["g1"], params["be1"])
    h = jnp.maximum(x1 @ params["w1"].T + params["b1"][0], 0.0)
    f = h @ params["w2"].T + params["b2"][0]
    return ln(x1 + f, params["g2"], params["be2"])


if __name__ == "__main__":
    B, S, D, H, F = 2, 8, 32, 4, 64  # batch, seq, d_model, n_heads, d_ff

    key = jax.random.PRNGKey(0)
    ks = jax.random.split(key, 9)

    def init(k, shape, scale=0.1):
        return (scale * jax.random.normal(k, shape)).astype(jnp.float32)

    params = {
        "wqkv": init(ks[0], (3 * D, D)),
        "bqkv": init(ks[1], (1, 3 * D)),
        "wo":   init(ks[2], (D, D)),
        "bo":   init(ks[3], (1, D)),
        "g1":   jnp.ones((1, D), jnp.float32),
        "be1":  jnp.zeros((1, D), jnp.float32),
        "w1":   init(ks[4], (F, D)),
        "b1":   init(ks[5], (1, F)),
        "w2":   init(ks[6], (D, F)),
        "b2":   init(ks[7], (1, D)),
        "g2":   jnp.ones((1, D), jnp.float32),
        "be2":  jnp.zeros((1, D), jnp.float32),
    }

    src = init(ks[8], (B, S, D), scale=1.0)

    # One-time weight re-layout (at parameter-init time); pass weights_dtype=jnp.bfloat16
    # on v6e/v7x at production sizes.
    prep = prepare_encoder_params(params, n_heads=H, weights_dtype=jnp.float32)

    out = transformer_encoder_layer(src, prep, n_heads=H)
    out = jax.block_until_ready(out)

    ref = _reference(src, params, n_heads=H)
    assert out.shape == (B, S, D)
    assert jnp.allclose(out, ref, atol=1e-4, rtol=1e-4), float(jnp.max(jnp.abs(out - ref)))

    print("KERNEL_OK")
</pallas_src>

<mosaic_0001>
module attributes {stable_mosaic.version = 11 : i64} {
  func.func @encoder_layer_kernel(%arg0: i32, %arg1: memref<8x32xf32, #tpu.memory_space<vmem>>, %arg2: memref<32x96xf32, #tpu.memory_space<vmem>>, %arg3: memref<1x96xf32, #tpu.memory_space<vmem>>, %arg4: memref<32x32xf32, #tpu.memory_space<vmem>>, %arg5: memref<1x32xf32, #tpu.memory_space<vmem>>, %arg6: memref<1x32xf32, #tpu.memory_space<vmem>>, %arg7: memref<1x32xf32, #tpu.memory_space<vmem>>, %arg8: memref<32x64xf32, #tpu.memory_space<vmem>>, %arg9: memref<1x64xf32, #tpu.memory_space<vmem>>, %arg10: memref<64x32xf32, #tpu.memory_space<vmem>>, %arg11: memref<1x32xf32, #tpu.memory_space<vmem>>, %arg12: memref<1x32xf32, #tpu.memory_space<vmem>>, %arg13: memref<1x32xf32, #tpu.memory_space<vmem>>, %arg14: memref<8x32xf32, #tpu.memory_space<vmem>>) attributes {dimension_semantics = [#tpu.dimension_semantics<parallel>], iteration_bounds = array<i64: 2>, scalar_prefetch = 0 : i64, scratch_operands = 0 : i64, tpu.core_type = #tpu.core_type<tc>, window_params = [{transform_indices = @transform_0, window_bounds = array<i64: 8, 32>}, {pipeline_mode = #tpu.pipeline_mode<synchronous>, transform_indices = @transform_1, window_bounds = array<i64: 32, 96>}, {pipeline_mode = #tpu.pipeline_mode<synchronous>, transform_indices = @transform_2, window_bounds = array<i64: 1, 96>}, {pipeline_mode = #tpu.pipeline_mode<synchronous>, transform_indices = @transform_3, window_bounds = array<i64: 32, 32>}, {pipeline_mode = #tpu.pipeline_mode<synchronous>, transform_indices = @transform_4, window_bounds = array<i64: 1, 32>}, {pipeline_mode = #tpu.pipeline_mode<synchronous>, transform_indices = @transform_5, window_bounds = array<i64: 1, 32>}, {pipeline_mode = #tpu.pipeline_mode<synchronous>, transform_indices = @transform_6, window_bounds = array<i64: 1, 32>}, {pipeline_mode = #tpu.pipeline_mode<synchronous>, transform_indices = @transform_7, window_bounds = array<i64: 32, 64>}, {pipeline_mode = #tpu.pipeline_mode<synchronous>, transform_indices = @transform_8, window_bounds = array<i64: 1, 64>}, {pipeline_mode = #tpu.pipeline_mode<synchronous>, transform_indices = @transform_9, window_bounds = array<i64: 64, 32>}, {pipeline_mode = #tpu.pipeline_mode<synchronous>, transform_indices = @transform_10, window_bounds = array<i64: 1, 32>}, {pipeline_mode = #tpu.pipeline_mode<synchronous>, transform_indices = @transform_11, window_bounds = array<i64: 1, 32>}, {pipeline_mode = #tpu.pipeline_mode<synchronous>, transform_indices = @transform_12, window_bounds = array<i64: 1, 32>}, {transform_indices = @transform_13, window_bounds = array<i64: 8, 32>}]} {
    %c0 = arith.constant 0 : index
    %c0_0 = arith.constant 0 : index
    %0 = vector.load %arg1[%c0, %c0_0] : memref<8x32xf32, #tpu.memory_space<vmem>>, vector<8x32xf32>
    %c0_1 = arith.constant 0 : index
    %c0_2 = arith.constant 0 : index
    %1 = vector.load %arg2[%c0_1, %c0_2] : memref<32x96xf32, #tpu.memory_space<vmem>>, vector<32x96xf32>
    %cst = arith.constant dense<0.000000e+00> : vector<8x96xf32>
    %2 = tpu.matmul %0, %1, %cst {dimension_numbers = #tpu.dot_dimension_numbers<[1], [0], [0], [1], [0, 0, 1, 1], [], []>} : vector<8x32xf32>, vector<32x96xf32>, vector<8x96xf32> -> vector<8x96xf32>
    %c0_3 = arith.constant 0 : index
    %c0_4 = arith.constant 0 : index
    %3 = vector.load %arg3[%c0_3, %c0_4] : memref<1x96xf32, #tpu.memory_space<vmem>>, vector<1x96xf32>
    %4 = vector.broadcast %3 : vector<1x96xf32> to vector<8x96xf32>
    %5 = arith.addf %2, %4 : vector<8x96xf32>
    %6 = vector.extract_strided_slice %5 {offsets = [0, 0], sizes = [8, 32], strides = [1, 1]} : vector<8x96xf32> to vector<8x32xf32>
    %7 = vector.shape_cast %6 : vector<8x32xf32> to vector<1x8x32xf32>
    %8 = vector.extract_strided_slice %5 {offsets = [0, 32], sizes = [8, 32], strides = [1, 1]} : vector<8x96xf32> to vector<8x32xf32>
    %9 = vector.shape_cast %8 : vector<8x32xf32> to vector<1x8x32xf32>
    %10 = vector.extract_strided_slice %5 {offsets = [0, 64], sizes = [8, 32], strides = [1, 1]} : vector<8x96xf32> to vector<8x32xf32>
    %11 = vector.shape_cast %10 : vector<8x32xf32> to vector<1x8x32xf32>
    %12 = vector.extract_strided_slice %7 {offsets = [0, 0, 0], sizes = [1, 8, 8], strides = [1, 1, 1]} : vector<1x8x32xf32> to vector<1x8x8xf32>
    %13 = vector.extract_strided_slice %9 {offsets = [0, 0, 0], sizes = [1, 8, 8], strides = [1, 1, 1]} : vector<1x8x32xf32> to vector<1x8x8xf32>
    %14 = vector.extract_strided_slice %11 {offsets = [0, 0, 0], sizes = [1, 8, 8], strides = [1, 1, 1]} : vector<1x8x32xf32> to vector<1x8x8xf32>
    "tpu.trace_start"() <{level = 10 : i32, message = "bqd,bkd->bqk"}> : () -> ()
    %cst_5 = arith.constant dense<0.000000e+00> : vector<1x8x8xf32>
    %15 = tpu.matmul %12, %13, %cst_5 {dimension_numbers = #tpu.dot_dimension_numbers<[2], [2], [1], [1], [0, 0, 0, 1, 1, 1], [0], [0]>} : vector<1x8x8xf32>, vector<1x8x8xf32>, vector<1x8x8xf32> -> vector<1x8x8xf32>
    "tpu.trace_stop"() : () -> ()
    %cst_6 = arith.constant dense<0xFF800000> : vector<1x8xf32>
    %16 = vector.multi_reduction <maximumf>, %15, %cst_6 [2] : vector<1x8x8xf32> to vector<1x8xf32>
    %17 = vector.shape_cast %16 : vector<1x8xf32> to vector<1x8x1xf32>
    %18 = vector.broadcast %17 : vector<1x8x1xf32> to vector<1x8x8xf32>
    %19 = arith.subf %15, %18 : vector<1x8x8xf32>
    %20 = math.exp %19 : vector<1x8x8xf32>
    %cst_7 = arith.constant dense<0.000000e+00> : vector<1x8xf32>
    %21 = vector.multi_reduction <add>, %20, %cst_7 [2] : vector<1x8x8xf32> to vector<1x8xf32>
    %22 = vector.shape_cast %21 : vector<1x8xf32> to vector<1x8x1xf32>
    %23 = vector.broadcast %22 : vector<1x8x1xf32> to vector<1x8x8xf32>
    %24 = arith.divf %20, %23 : vector<1x8x8xf32>
    "tpu.trace_start"() <{level = 10 : i32, message = "bqk,bkd->bqd"}> : () -> ()
    %cst_8 = arith.constant dense<0.000000e+00> : vector<1x8x8xf32>
    %25 = tpu.matmul %24, %14, %cst_8 {dimension_numbers = #tpu.dot_dimension_numbers<[2], [1], [1], [2], [0, 0, 0, 1, 1, 2], [0], [0]>} : vector<1x8x8xf32>, vector<1x8x8xf32>, vector<1x8x8xf32> -> vector<1x8x8xf32>
    "tpu.trace_stop"() : () -> ()
    %26 = vector.extract_strided_slice %7 {offsets = [0, 0, 8], sizes = [1, 8, 8], strides = [1, 1, 1]} : vector<1x8x32xf32> to vector<1x8x8xf32>
    %27 = vector.extract_strided_slice %9 {offsets = [0, 0, 8], sizes = [1, 8, 8], strides = [1, 1, 1]} : vector<1x8x32xf32> to vector<1x8x8xf32>
    %28 = vector.extract_strided_slice %11 {offsets = [0, 0, 8], sizes = [1, 8, 8], strides = [1, 1, 1]} : vector<1x8x32xf32> to vector<1x8x8xf32>
    "tpu.trace_start"() <{level = 10 : i32, message = "bqd,bkd->bqk"}> : () -> ()
    %cst_9 = arith.constant dense<0.000000e+00> : vector<1x8x8xf32>
    %29 = tpu.matmul %26, %27, %cst_9 {dimension_numbers = #tpu.dot_dimension_numbers<[2], [2], [1], [1], [0, 0, 0, 1, 1, 1], [0], [0]>} : vector<1x8x8xf32>, vector<1x8x8xf32>, vector<1x8x8xf32> -> vector<1x8x8xf32>
    "tpu.trace_stop"() : () -> ()
    %cst_10 = arith.constant dense<0xFF800000> : vector<1x8xf32>
    %30 = vector.multi_reduction <maximumf>, %29, %cst_10 [2] : vector<1x8x8xf32> to vector<1x8xf32>
    %31 = vector.shape_cast %30 : vector<1x8xf32> to vector<1x8x1xf32>
    %32 = vector.broadcast %31 : vector<1x8x1xf32> to vector<1x8x8xf32>
    %33 = arith.subf %29, %32 : vector<1x8x8xf32>
    %34 = math.exp %33 : vector<1x8x8xf32>
    %cst_11 = arith.constant dense<0.000000e+00> : vector<1x8xf32>
    %35 = vector.multi_reduction <add>, %34, %cst_11 [2] : vector<1x8x8xf32> to vector<1x8xf32>
    %36 = vector.shape_cast %35 : vector<1x8xf32> to vector<1x8x1xf32>
    %37 = vector.broadcast %36 : vector<1x8x1xf32> to vector<1x8x8xf32>
    %38 = arith.divf %34, %37 : vector<1x8x8xf32>
    "tpu.trace_start"() <{level = 10 : i32, message = "bqk,bkd->bqd"}> : () -> ()
    %cst_12 = arith.constant dense<0.000000e+00> : vector<1x8x8xf32>
    %39 = tpu.matmul %38, %28, %cst_12 {dimension_numbers = #tpu.dot_dimension_numbers<[2], [1], [1], [2], [0, 0, 0, 1, 1, 2], [0], [0]>} : vector<1x8x8xf32>, vector<1x8x8xf32>, vector<1x8x8xf32> -> vector<1x8x8xf32>
    "tpu.trace_stop"() : () -> ()
    %40 = vector.extract_strided_slice %7 {offsets = [0, 0, 16], sizes = [1, 8, 8], strides = [1, 1, 1]} : vector<1x8x32xf32> to vector<1x8x8xf32>
    %41 = vector.extract_strided_slice %9 {offsets = [0, 0, 16], sizes = [1, 8, 8], strides = [1, 1, 1]} : vector<1x8x32xf32> to vector<1x8x8xf32>
    %42 = vector.extract_strided_slice %11 {offsets = [0, 0, 16], sizes = [1, 8, 8], strides = [1, 1, 1]} : vector<1x8x32xf32> to vector<1x8x8xf32>
    "tpu.trace_start"() <{level = 10 : i32, message = "bqd,bkd->bqk"}> : () -> ()
    %cst_13 = arith.constant dense<0.000000e+00> : vector<1x8x8xf32>
    %43 = tpu.matmul %40, %41, %cst_13 {dimension_numbers = #tpu.dot_dimension_numbers<[2], [2], [1], [1], [0, 0, 0, 1, 1, 1], [0], [0]>} : vector<1x8x8xf32>, vector<1x8x8xf32>, vector<1x8x8xf32> -> vector<1x8x8xf32>
    "tpu.trace_stop"() : () -> ()
    %cst_14 = arith.constant dense<0xFF800000> : vector<1x8xf32>
    %44 = vector.multi_reduction <maximumf>, %43, %cst_14 [2] : vector<1x8x8xf32> to vector<1x8xf32>
    %45 = vector.shape_cast %44 : vector<1x8xf32> to vector<1x8x1xf32>
    %46 = vector.broadcast %45 : vector<1x8x1xf32> to vector<1x8x8xf32>
    %47 = arith.subf %43, %46 : vector<1x8x8xf32>
    %48 = math.exp %47 : vector<1x8x8xf32>
    %cst_15 = arith.constant dense<0.000000e+00> : vector<1x8xf32>
    %49 = vector.multi_reduction <add>, %48, %cst_15 [2] : vector<1x8x8xf32> to vector<1x8xf32>
    %50 = vector.shape_cast %49 : vector<1x8xf32> to vector<1x8x1xf32>
    %51 = vector.broadcast %50 : vector<1x8x1xf32> to vector<1x8x8xf32>
    %52 = arith.divf %48, %51 : vector<1x8x8xf32>
    "tpu.trace_start"() <{level = 10 : i32, message = "bqk,bkd->bqd"}> : () -> ()
    %cst_16 = arith.constant dense<0.000000e+00> : vector<1x8x8xf32>
    %53 = tpu.matmul %52, %42, %cst_16 {dimension_numbers = #tpu.dot_dimension_numbers<[2], [1], [1], [2], [0, 0, 0, 1, 1, 2], [0], [0]>} : vector<1x8x8xf32>, vector<1x8x8xf32>, vector<1x8x8xf32> -> vector<1x8x8xf32>
    "tpu.trace_stop"() : () -> ()
    %54 = vector.extract_strided_slice %7 {offsets = [0, 0, 24], sizes = [1, 8, 8], strides = [1, 1, 1]} : vector<1x8x32xf32> to vector<1x8x8xf32>
    %55 = vector.extract_strided_slice %9 {offsets = [0, 0, 24], sizes = [1, 8, 8], strides = [1, 1, 1]} : vector<1x8x32xf32> to vector<1x8x8xf32>
    %56 = vector.extract_strided_slice %11 {offsets = [0, 0, 24], sizes = [1, 8, 8], strides = [1, 1, 1]} : vector<1x8x32xf32> to vector<1x8x8xf32>
    "tpu.trace_start"() <{level = 10 : i32, message = "bqd,bkd->bqk"}> : () -> ()
    %cst_17 = arith.constant dense<0.000000e+00> : vector<1x8x8xf32>
    %57 = tpu.matmul %54, %55, %cst_17 {dimension_numbers = #tpu.dot_dimension_numbers<[2], [2], [1], [1], [0, 0, 0, 1, 1, 1], [0], [0]>} : vector<1x8x8xf32>, vector<1x8x8xf32>, vector<1x8x8xf32> -> vector<1x8x8xf32>
    "tpu.trace_stop"() : () -> ()
    %cst_18 = arith.constant dense<0xFF800000> : vector<1x8xf32>
    %58 = vector.multi_reduction <maximumf>, %57, %cst_18 [2] : vector<1x8x8xf32> to vector<1x8xf32>
    %59 = vector.shape_cast %58 : vector<1x8xf32> to vector<1x8x1xf32>
    %60 = vector.broadcast %59 : vector<1x8x1xf32> to vector<1x8x8xf32>
    %61 = arith.subf %57, %60 : vector<1x8x8xf32>
    %62 = math.exp %61 : vector<1x8x8xf32>
    %cst_19 = arith.constant dense<0.000000e+00> : vector<1x8xf32>
    %63 = vector.multi_reduction <add>, %62, %cst_19 [2] : vector<1x8x8xf32> to vector<1x8xf32>
    %64 = vector.shape_cast %63 : vector<1x8xf32> to vector<1x8x1xf32>
    %65 = vector.broadcast %64 : vector<1x8x1xf32> to vector<1x8x8xf32>
    %66 = arith.divf %62, %65 : vector<1x8x8xf32>
    "tpu.trace_start"() <{level = 10 : i32, message = "bqk,bkd->bqd"}> : () -> ()
    %cst_20 = arith.constant dense<0.000000e+00> : vector<1x8x8xf32>
    %67 = tpu.matmul %66, %56, %cst_20 {dimension_numbers = #tpu.dot_dimension_numbers<[2], [1], [1], [2], [0, 0, 0, 1, 1, 2], [0], [0]>} : vector<1x8x8xf32>, vector<1x8x8xf32>, vector<1x8x8xf32> -> vector<1x8x8xf32>
    "tpu.trace_stop"() : () -> ()
    %68 = tpu.concatenate %25, %39, %53, %67 in 2 : vector<1x8x8xf32>, vector<1x8x8xf32>, vector<1x8x8xf32>, vector<1x8x8xf32> -> vector<1x8x32xf32>
    %69 = vector.shape_cast %68 : vector<1x8x32xf32> to vector<8x32xf32>
    %c0_21 = arith.constant 0 : index
    %c0_22 = arith.constant 0 : index
    %70 = vector.load %arg4[%c0_21, %c0_22] : memref<32x32xf32, #tpu.memory_space<vmem>>, vector<32x32xf32>
    %cst_23 = arith.constant dense<0.000000e+00> : vector<8x32xf32>
    %71 = tpu.matmul %69, %70, %cst_23 {dimension_numbers = #tpu.dot_dimension_numbers<[1], [0], [0], [1], [0, 0, 1, 1], [], []>} : vector<8x32xf32>, vector<32x32xf32>, vector<8x32xf32> -> vector<8x32xf32>
    %c0_24 = arith.constant 0 : index
    %c0_25 = arith.constant 0 : index
    %72 = vector.load %arg5[%c0_24, %c0_25] : memref<1x32xf32, #tpu.memory_space<vmem>>, vector<1x32xf32>
    %73 = vector.broadcast %72 : vector<1x32xf32> to vector<8x32xf32>
    %74 = arith.addf %71, %73 : vector<8x32xf32>
    %75 = arith.addf %0, %74 : vector<8x32xf32>
    %c0_26 = arith.constant 0 : index
    %c0_27 = arith.constant 0 : index
    %76 = vector.load %arg6[%c0_26, %c0_27] : memref<1x32xf32, #tpu.memory_space<vmem>>, vector<1x32xf32>
    %c0_28 = arith.constant 0 : index
    %c0_29 = arith.constant 0 : index
    %77 = vector.load %arg7[%c0_28, %c0_29] : memref<1x32xf32, #tpu.memory_space<vmem>>, vector<1x32xf32>
    %cst_30 = arith.constant dense<0.000000e+00> : vector<8xf32>
    %78 = vector.multi_reduction <add>, %75, %cst_30 [1] : vector<8x32xf32> to vector<8xf32>
    %79 = vector.shape_cast %78 : vector<8xf32> to vector<8x1xf32>
    %cst_31 = arith.constant 3.200000e+01 : f32
    %80 = vector.broadcast %cst_31 : f32 to vector<8x1xf32>
    %81 = arith.divf %79, %80 : vector<8x1xf32>
    %82 = vector.broadcast %81 : vector<8x1xf32> to vector<8x32xf32>
    %83 = arith.subf %75, %82 : vector<8x32xf32>
    %84 = vector.broadcast %81 : vector<8x1xf32> to vector<8x32xf32>
    %85 = arith.subf %75, %84 : vector<8x32xf32>
    %86 = arith.mulf %83, %85 : vector<8x32xf32>
    %cst_32 = arith.constant dense<0.000000e+00> : vector<8xf32>
    %87 = vector.multi_reduction <add>, %86, %cst_32 [1] : vector<8x32xf32> to vector<8xf32>
    %88 = vector.shape_cast %87 : vector<8xf32> to vector<8x1xf32>
    %cst_33 = arith.constant 3.200000e+01 : f32
    %89 = vector.broadcast %cst_33 : f32 to vector<8x1xf32>
    %90 = arith.divf %88, %89 : vector<8x1xf32>
    %91 = vector.broadcast %81 : vector<8x1xf32> to vector<8x32xf32>
    %92 = arith.subf %75, %91 : vector<8x32xf32>
    %cst_34 = arith.constant 9.99999974E-6 : f32
    %93 = vector.broadcast %cst_34 : f32 to vector<8x1xf32>
    %94 = arith.addf %90, %93 : vector<8x1xf32>
    %95 = math.rsqrt %94 : vector<8x1xf32>
    %96 = vector.broadcast %95 : vector<8x1xf32> to vector<8x32xf32>
    %97 = arith.mulf %92, %96 : vector<8x32xf32>
    %98 = vector.broadcast %76 : vector<1x32xf32> to vector<8x32xf32>
    %99 = arith.mulf %97, %98 : vector<8x32xf32>
    %100 = vector.broadcast %77 : vector<1x32xf32> to vector<8x32xf32>
    %101 = arith.addf %99, %100 : vector<8x32xf32>
    %c0_35 = arith.constant 0 : index
    %c0_36 = arith.constant 0 : index
    %102 = vector.load %arg8[%c0_35, %c0_36] : memref<32x64xf32, #tpu.memory_space<vmem>>, vector<32x64xf32>
    %cst_37 = arith.constant dense<0.000000e+00> : vector<8x64xf32>
    %103 = tpu.matmul %101, %102, %cst_37 {dimension_numbers = #tpu.dot_dimension_numbers<[1], [0], [0], [1], [0, 0, 1, 1], [], []>} : vector<8x32xf32>, vector<32x64xf32>, vector<8x64xf32> -> vector<8x64xf32>
    %c0_38 = arith.constant 0 : index
    %c0_39 = arith.constant 0 : index
    %104 = vector.load %arg9[%c0_38, %c0_39] : memref<1x64xf32, #tpu.memory_space<vmem>>, vector<1x64xf32>
    %105 = vector.broadcast %104 : vector<1x64xf32> to vector<8x64xf32>
    %106 = arith.addf %103, %105 : vector<8x64xf32>
    %cst_40 = arith.constant 0.000000e+00 : f32
    %107 = vector.broadcast %cst_40 : f32 to vector<8x64xf32>
    %108 = arith.maximumf %106, %107 : vector<8x64xf32>
    %c0_41 = arith.constant 0 : index
    %c0_42 = arith.constant 0 : index
    %109 = vector.load %arg10[%c0_41, %c0_42] : memref<64x32xf32, #tpu.memory_space<vmem>>, vector<64x32xf32>
    %cst_43 = arith.constant dense<0.000000e+00> : vector<8x32xf32>
    %110 = tpu.matmul %108, %109, %cst_43 {dimension_numbers = #tpu.dot_dimension_numbers<[1], [0], [0], [1], [0, 0, 1, 1], [], []>} : vector<8x64xf32>, vector<64x32xf32>, vector<8x32xf32> -> vector<8x32xf32>
    %c0_44 = arith.constant 0 : index
    %c0_45 = arith.constant 0 : index
    %111 = vector.load %arg11[%c0_44, %c0_45] : memref<1x32xf32, #tpu.memory_space<vmem>>, vector<1x32xf32>
    %112 = vector.broadcast %111 : vector<1x32xf32> to vector<8x32xf32>
    %113 = arith.addf %110, %112 : vector<8x32xf32>
    %114 = arith.addf %101, %113 : vector<8x32xf32>
    %c0_46 = arith.constant 0 : index
    %c0_47 = arith.constant 0 : index
    %115 = vector.load %arg12[%c0_46, %c0_47] : memref<1x32xf32, #tpu.memory_space<vmem>>, vector<1x32xf32>
    %c0_48 = arith.constant 0 : index
    %c0_49 = arith.constant 0 : index
    %116 = vector.load %arg13[%c0_48, %c0_49] : memref<1x32xf32, #tpu.memory_space<vmem>>, vector<1x32xf32>
    %cst_50 = arith.constant dense<0.000000e+00> : vector<8xf32>
    %117 = vector.multi_reduction <add>, %114, %cst_50 [1] : vector<8x32xf32> to vector<8xf32>
    %118 = vector.shape_cast %117 : vector<8xf32> to vector<8x1xf32>
    %cst_51 = arith.constant 3.200000e+01 : f32
    %119 = vector.broadcast %cst_51 : f32 to vector<8x1xf32>
    %120 = arith.divf %118, %119 : vector<8x1xf32>
    %121 = vector.broadcast %120 : vector<8x1xf32> to vector<8x32xf32>
    %122 = arith.subf %114, %121 : vector<8x32xf32>
    %123 = vector.broadcast %120 : vector<8x1xf32> to vector<8x32xf32>
    %124 = arith.subf %114, %123 : vector<8x32xf32>
    %125 = arith.mulf %122, %124 : vector<8x32xf32>
    %cst_52 = arith.constant dense<0.000000e+00> : vector<8xf32>
    %126 = vector.multi_reduction <add>, %125, %cst_52 [1] : vector<8x32xf32> to vector<8xf32>
    %127 = vector.shape_cast %126 : vector<8xf32> to vector<8x1xf32>
    %cst_53 = arith.constant 3.200000e+01 : f32
    %128 = vector.broadcast %cst_53 : f32 to vector<8x1xf32>
    %129 = arith.divf %127, %128 : vector<8x1xf32>
    %130 = vector.broadcast %120 : vector<8x1xf32> to vector<8x32xf32>
    %131 = arith.subf %114, %130 : vector<8x32xf32>
    %cst_54 = arith.constant 9.99999974E-6 : f32
    %132 = vector.broadcast %cst_54 : f32 to vector<8x1xf32>
    %133 = arith.addf %129, %132 : vector<8x1xf32>
    %134 = math.rsqrt %133 : vector<8x1xf32>
    %135 = vector.broadcast %134 : vector<8x1xf32> to vector<8x32xf32>
    %136 = arith.mulf %131, %135 : vector<8x32xf32>
    %137 = vector.broadcast %115 : vector<1x32xf32> to vector<8x32xf32>
    %138 = arith.mulf %136, %137 : vector<8x32xf32>
    %139 = vector.broadcast %116 : vector<1x32xf32> to vector<8x32xf32>
    %140 = arith.addf %138, %139 : vector<8x32xf32>
    %c0_55 = arith.constant 0 : index
    %c0_56 = arith.constant 0 : index
    %141 = vector.load %arg14[%c0_55, %c0_56] : memref<8x32xf32, #tpu.memory_space<vmem>>, vector<8x32xf32>
    tpu.vector_store %arg14[%c0_55, %c0_56], %140 {strides = array<i32>} : memref<8x32xf32, #tpu.memory_space<vmem>>, vector<8x32xf32>,
    return
  }
  func.func @transform_0(%arg0: i32) -> (i32, i32) {
    %c0_i32 = arith.constant 0 : i32
    %c0_i32_0 = arith.constant 0 : i32
    return %arg0, %c0_i32 : i32, i32
  }
  func.func @transform_1(%arg0: i32) -> (i32, i32) {
    %c0_i32 = arith.constant 0 : i32
    %c0_i32_0 = arith.constant 0 : i32
    %c0_i32_1 = arith.constant 0 : i32
    return %c0_i32, %c0_i32_0 : i32, i32
  }
  func.func @transform_2(%arg0: i32) -> (i32, i32) {
    %c0_i32 = arith.constant 0 : i32
    %c0_i32_0 = arith.constant 0 : i32
    %c0_i32_1 = arith.constant 0 : i32
    return %c0_i32, %c0_i32_0 : i32, i32
  }
  func.func @transform_3(%arg0: i32) -> (i32, i32) {
    %c0_i32 = arith.constant 0 : i32
    %c0_i32_0 = arith.constant 0 : i32
    %c0_i32_1 = arith.constant 0 : i32
    return %c0_i32, %c0_i32_0 : i32, i32
  }
  func.func @transform_4(%arg0: i32) -> (i32, i32) {
    %c0_i32 = arith.constant 0 : i32
    %c0_i32_0 = arith.constant 0 : i32
    %c0_i32_1 = arith.constant 0 : i32
    return %c0_i32, %c0_i32_0 : i32, i32
  }
  func.func @transform_5(%arg0: i32) -> (i32, i32) {
    %c0_i32 = arith.constant 0 : i32
    %c0_i32_0 = arith.constant 0 : i32
    %c0_i32_1 = arith.constant 0 : i32
    return %c0_i32, %c0_i32_0 : i32, i32
  }
  func.func @transform_6(%arg0: i32) -> (i32, i32) {
    %c0_i32 = arith.constant 0 : i32
    %c0_i32_0 = arith.constant 0 : i32
    %c0_i32_1 = arith.constant 0 : i32
    return %c0_i32, %c0_i32_0 : i32, i32
  }
  func.func @transform_7(%arg0: i32) -> (i32, i32) {
    %c0_i32 = arith.constant 0 : i32
    %c0_i32_0 = arith.constant 0 : i32
    %c0_i32_1 = arith.constant 0 : i32
    return %c0_i32, %c0_i32_0 : i32, i32
  }
  func.func @transform_8(%arg0: i32) -> (i32, i32) {
    %c0_i32 = arith.constant 0 : i32
    %c0_i32_0 = arith.constant 0 : i32
    %c0_i32_1 = arith.constant 0 : i32
    return %c0_i32, %c0_i32_0 : i32, i32
  }
  func.func @transform_9(%arg0: i32) -> (i32, i32) {
    %c0_i32 = arith.constant 0 : i32
    %c0_i32_0 = arith.constant 0 : i32
    %c0_i32_1 = arith.constant 0 : i32
    return %c0_i32, %c0_i32_0 : i32, i32
  }
  func.func @transform_10(%arg0: i32) -> (i32, i32) {
    %c0_i32 = arith.constant 0 : i32
    %c0_i32_0 = arith.constant 0 : i32
    %c0_i32_1 = arith.constant 0 : i32
    return %c0_i32, %c0_i32_0 : i32, i32
  }
  func.func @transform_11(%arg0: i32) -> (i32, i32) {
    %c0_i32 = arith.constant 0 : i32
    %c0_i32_0 = arith.constant 0 : i32
    %c0_i32_1 = arith.constant 0 : i32
    return %c0_i32, %c0_i32_0 : i32, i32
  }
  func.func @transform_12(%arg0: i32) -> (i32, i32) {
    %c0_i32 = arith.constant 0 : i32
    %c0_i32_0 = arith.constant 0 : i32
    %c0_i32_1 = arith.constant 0 : i32
    return %c0_i32, %c0_i32_0 : i32, i32
  }
  func.func @transform_13(%arg0: i32) -> (i32, i32) {
    %c0_i32 = arith.constant 0 : i32
    %c0_i32_0 = arith.constant 0 : i32
    return %arg0, %c0_i32 : i32, i32
  }
}

</mosaic_0001>

<bundles_post_ra>
// kernel: tpu_custom_call.1
= control target key start
LH: loop header
LB: loop body
LE: loop exit
PB: predicated region body
PF: predicated region fallthrough
CT: control target
= control target key end

     0   :  { %s2711_s0 = inlined_call_operand.hbm [shape: f32[16,32], index: 0, kind: input, shape index: {}]   ;;  %s2712_s1 = inlined_call_operand.vmem [shape: f32[32,96], index: 1, kind: input, shape index: {}]   ;;  %s2713_s2 = inlined_call_operand.vmem [shape: f32[1,96], index: 2, kind: input, shape index: {}]   ;;  %s2714_s3 = inlined_call_operand.vmem [shape: f32[32,32], index: 3, kind: input, shape index: {}]   ;;  %s2715_s4 = inlined_call_operand.vmem [shape: f32[1,32], index: 4, kind: input, shape index: {}]   ;;  %s2716_s5 = inlined_call_operand.hbm [shape: f32[1,32], index: 5, kind: input, shape index: {}]   ;;  %s2717_s6 = inlined_call_operand.hbm [shape: f32[1,32], index: 6, kind: input, shape index: {}]   ;;  %s2718_s7 = inlined_call_operand.vmem [shape: f32[32,64], index: 7, kind: input, shape index: {}]   ;;  %s2719_s8 = inlined_call_operand.hbm [shape: f32[1,64], index: 8, kind: input, shape index: {}]   ;;  %s2720_s9 = inlined_call_operand.vmem [shape: f32[64,32], index: 9, kind: input, shape index: {}]   ;;  %s2721_s10 = inlined_call_operand.vmem [shape: f32[1,32], index: 10, kind: input, shape index: {}]   ;;  %s2722_s11 = inlined_call_operand.vmem [shape: f32[1,32], index: 11, kind: input, shape index: {}]   ;;  %s2723_s12 = inlined_call_operand.vmem [shape: f32[1,32], index: 12, kind: input, shape index: {}]   ;;  %s2724_s13 = inlined_call_operand.hbm [shape: f32[16,32], index: 13, kind: output, shape index: {}]  }
   0x1   :  { %2731 = sst [smem:[#allocation17_spill]] %s2711_s0 }
   0x2   :  { %2732 = sst [smem:[#allocation18_spill]] %s2712_s1 }
   0x3   :  { %2733 = sst [smem:[#allocation19_spill]] %s2722_s11 }
   0x4   :  { %2734 = sst [smem:[#allocation20_spill]] %s2723_s12 }
   0x5   :  { %2735 = sst [smem:[#allocation21_spill]] %s2724_s13 }
   0x6   :  { %18 = vsyncpa [#allocation3], 0 }
   0x7   :  { %20 = vsyncpa [#allocation3 + $0x1], 0 }
   0x8   :  { %21 = vsyncpa [#allocation6], 0 }
   0x9   :  { %22 = vsyncpa [#allocation9], 0 }
   0xa   :  { %23 = vsyncpa [#allocation4], 0 }
   0xb   :  { %25 = vsyncpa [#allocation4 + $0x1], 0  ;;  %s2290_s25 = smov 0   ;;  %s2292_s26 = smov 0  }
   0xc   :  { %s2294_s27 = smov 0   ;;  %s2296_s28 = smov 0  }
   0xd LB: > { %2736 = sst [smem:[#allocation15_spill]] %s2184_s25  ;;  %s2311_s29 = sadd.s32 4294967295, %s2196_s28   ;;  %s2196_s28 = sphi %s2296_s28, %s2764_s28   ;;  %s2192_s27 = sphi %s2294_s27, %s2763_s27   ;;  %s2188_s26 = sphi %s2292_s26, %s2762_s26   ;;  %s2184_s25 = sphi %s2290_s25, %s2761_s25  }
   0xe   : > { %s1690_s30 = sadd.s32 4294967294, %s2196_s28   ;;  %p51_p0 = scmp.ne.s32.totalorder %s2188_s26, %s2184_s25 }
   0xf   : > { %p2728_p1 = scmp.eq.s32.totalorder %s2311_s29, 0  ;;  %p333_p3 = scmp.eq.s32.totalorder %s1690_s30, 1 }
  0x10   : > { %p1691_p5 = scmp.ge.s32.totalorder %s2196_s28, 1  ;;  %p340_p7 = scmp.lt.s32.totalorder %s2196_s28, 3 }
  0x11   : > { %p2320_p4 = por %p2728_p1, %p51_p0  ;;  %p2325_p6 = por %p333_p3, %p51_p0 }
  0x12   : > { %p2330_p8 = pnand %p1691_p5, %p340_p7  ;;  %s2198_s17 = smov [#allocation5]  }
  0x13   : > { %s2737_s14 = scalar_select %p2320_p4, 1, 0 }
  0x14   : > { %s2738_s15 = scalar_select %p2325_p6, 1, 0 }
  0x15   : > { %s2740_s16 = scalar_select %p2330_p8, 1, 0 }
  0x16   : > { %2739 = sst [smem:[#allocation16_spill]] %s2738_s15  ;;  %s365_s18 = sshll.u32 %s2198_s17, 4  ;;  %s366_s18 = int_to_ptr.vmem [resolvable:$true] %s365_s18 }
  0x17   : > { %p1910_p10 = pneg %p2330_p8  ;;  %s2199_s19 = smov [#allocation7]  }
  0x18   : > { %s376_s20 = sshll.u32 %s2199_s19, 4  ;;  %s2200_s22 = smov [#allocation8]   ;;  %s2343_s20 = int_to_ptr.vmem [resolvable:$true] %s376_s20 }
  0x19   : > { %p2339_p11 = pnand %p1910_p10, %p2728_p1  ;;  %s390_s23 = sshll.u32 %s2200_s22, 4  ;;  %s2345_s23 = int_to_ptr.vmem [resolvable:$true] %s390_s23 }
  0x1a   : > { %s2008_s17 = scalar_lea.hbm %s2716_s5, 16 }
  0x1b   : > { %p2009_p12 = scmp.ne.s32.totalorder %s2716_s5, %s2008_s17  ;;  %p2355_p13 = pneg %p2339_p11 }
  0x1c   : > { %p2015_p5 = scmp.lt.u32.totalorder %s2008_s17, %s2716_s5 }
  0x1d   : > { %p2011_p0 = pnand %p2355_p13, %p2009_p12 }
  0x1f   : > { %p2012_p3 = pneg %p2011_p0 }
  0x21   : > { %p2017_p7 = pnand %p2015_p5, %p2012_p3 }
  0x23   : > { %2020 = shalt.err (!%p2017_p7)
}
  0x24   : > { %s2021_s24 = scalar_lea.vmem %s366_s18, 16  ;;  %s2028_s25 = scalar_lea.vmem %s366_s18, 32 }
  0x25   : > { %p2022_p10 = scmp.ne.s32.totalorder %s366_s18, %s2021_s24  ;;  %p2029_p2 = scmp.lt.s32.totalorder %s366_s18, %s366_s18 }
  0x26   : > { %p2030_p6 = scmp.lt.s32.totalorder %s2028_s25, %s2021_s24 }
  0x27   : > { %p2024_p9 = pnand %p2022_p10, %p2355_p13 }
  0x28   : > { %p2031_p4 = por %p2030_p6, %p2029_p2 }
  0x29   : > { %p2025_p1 = pneg %p2024_p9 }
  0x2b   : > { %p2032_p8 = pnand %p2031_p4, %p2025_p1 }
  0x2d   : > { %2035 = shalt.err (!%p2032_p8)
}
  0x2e   : > { %1913 = dma.hbm_to_vmem [thread:$0]  (!%p2339_p11), %s2716_s5, 16, %s366_s18, [#allocation6]  }
  0x2f   : > { %s2036_s22 = scalar_lea.hbm %s2717_s6, 16 }
  0x30   : > { %p2037_p9 = scmp.ne.s32.totalorder %s2717_s6, %s2036_s22  ;;  %p2043_p1 = scmp.lt.u32.totalorder %s2036_s22, %s2717_s6 }
  0x32   : > { %p2039_p12 = pnand %p2037_p9, %p2355_p13 }
  0x34   : > { %p2040_p2 = pneg %p2039_p12 }
  0x36   : > { %p2045_p4 = pnand %p2043_p1, %p2040_p2 }
  0x38   : > { %2048 = shalt.err (!%p2045_p4)
}
  0x39   : > { %s2049_s18 = scalar_lea.vmem %s2343_s20, 16  ;;  %s2056_s11 = scalar_lea.vmem %s2343_s20, 32 }
  0x3a   : > { %p2050_p6 = scmp.ne.s32.totalorder %s2343_s20, %s2049_s18  ;;  %p2057_p3 = scmp.lt.s32.totalorder %s2343_s20, %s2343_s20 }
  0x3b   : > { %p2058_p5 = scmp.lt.s32.totalorder %s2056_s11, %s2049_s18 }
  0x3c   : > { %p2052_p8 = pnand %p2050_p6, %p2355_p13 }
  0x3d   : > { %p2059_p7 = por %p2058_p5, %p2057_p3 }
  0x3e   : > { %p2053_p0 = pneg %p2052_p8 }
  0x40   : > { %p2060_p10 = pnand %p2059_p7, %p2053_p0 }
  0x42   : > { %2063 = shalt.err (!%p2060_p10)
}
  0x43   : > { %1916 = dma.hbm_to_vmem [thread:$0]  (!%p2339_p11), %s2717_s6, 16, %s2343_s20, [#allocation6]  }
  0x44   : > { %s2064_s17 = scalar_lea.hbm %s2719_s8, 16 }
  0x45   : > { %p2065_p9 = scmp.ne.s32.totalorder %s2719_s8, %s2064_s17  ;;  %p2071_p1 = scmp.lt.u32.totalorder %s2064_s17, %s2719_s8 }
  0x47   : > { %p2067_p12 = pnand %p2065_p9, %p2355_p13 }
  0x49   : > { %p2068_p2 = pneg %p2067_p12 }
  0x4b   : > { %p2073_p4 = pnand %p2071_p1, %p2068_p2 }
  0x4d   : > { %2076 = shalt.err (!%p2073_p4)
}
  0x4e   : > { %s2077_s20 = scalar_lea.vmem %s2345_s23, 16  ;;  %s2084_s11 = scalar_lea.vmem %s2345_s23, 32 }
  0x4f   : > { %p2078_p6 = scmp.ne.s32.totalorder %s2345_s23, %s2077_s20  ;;  %p2085_p3 = scmp.lt.s32.totalorder %s2345_s23, %s2345_s23 }
  0x50   : > { %p2086_p5 = scmp.lt.s32.totalorder %s2084_s11, %s2077_s20 }
  0x51   : > { %p2080_p8 = pnand %p2078_p6, %p2355_p13 }
  0x52   : > { %p2087_p7 = por %p2086_p5, %p2085_p3 }
  0x53   : > { %p2081_p0 = pneg %p2080_p8 }
  0x55   : > { %p2088_p10 = pnand %p2087_p7, %p2081_p0 }
  0x57   : > { %2091 = shalt.err (!%p2088_p10)
}
  0x58   : > { %1919 = dma.hbm_to_vmem [thread:$0]  (!%p2339_p11), %s2719_s8, 16, %s2345_s23, [#allocation9]  }
  0x59   : > { %s2420_s19 = sadd.s32 1, %s2196_s28   ;;  %s38_s30 = sadd.s32 1, %s2192_s27 }
  0x5a   : > { %s35_s21 = ssub.s32 %s2196_s28, %s2420_s19  ;;  %p45_p9 = scmp.ne.s32.totalorder %s2192_s27, %s2188_s26 }
  0x5b   : > { %p36_p13 = scmp.eq.s32.totalorder %s35_s21, 0  ;;  %p46_p12 = scmp.eq.s32.totalorder %s2196_s28, 0 }
  0x5c   : > { %p1931_p2 = scmp.lt.s32.totalorder %s2196_s28, 2  ;;  %p2743_p4 = scmp.eq.s32.totalorder %s2311_s29, 1 }
  0x5d   : > { %s2430_s13 = scalar_select %p36_p13, %s2192_s27, %s38_s30  }
  0x5e   : > { %p47_p1 = por %p46_p12, %p45_p9  ;;  %p2434_p6 = por %p2743_p4, %p45_p9 }
  0x5f   : > { %s413_s22 = sand.u32 1, %s2192_s27   ;;  %s1697_s24 = sshll.u32 %s2196_s28, 7 }
  0x60   : > { %s1696_s23 = sshll.u32 %s413_s22, 3  ;;  %s2745_s0 = sld [smem:[#allocation17_spill]] }
  0x61   : > { %s417_s11 = scalar_lea.vmem [#allocation2], %s1696_s23  ;;  %p2445_p11 = pnand %p1931_p2, %p47_p1 }
  0x62   : > { %s424_s12 = sshll.u32 %s417_s11, 4  ;;  %s414_s21 = scalar_lea.sflag [#allocation3], %s413_s22  ;;  %s2449_s12 = int_to_ptr.vmem [resolvable:$true] %s424_s12 }
  0x63   : > { %p2094_p0 = pneg %p2445_p11 }
  0x66   : > { %s2443_s20 = scalar_lea.hbm %s2745_s0, %s1697_s24  ;;  %s2097_s25 = scalar_lea.hbm %s2745_s0, 256 }
  0x67   : > { %s2092_s30 = scalar_lea.hbm %s2443_s20, 128  ;;  %p2098_p7 = scmp.lt.u32.totalorder %s2443_s20, %s2745_s0 }
  0x68   : > { %p2093_p8 = scmp.ne.s32.totalorder %s2443_s20, %s2092_s30  ;;  %p2099_p10 = scmp.lt.u32.totalorder %s2097_s25, %s2092_s30 }
  0x69   : > { %p2101_p9 = scmp.lt.u32.totalorder %s2092_s30, %s2443_s20 }
  0x6a   : > { %p2095_p3 = pnand %p2094_p0, %p2093_p8  ;;  %p2100_p13 = por %p2099_p10, %p2098_p7 }
  0x6c   : > { %p2096_p5 = pneg %p2095_p3  ;;  %p2102_p12 = por %p2101_p9, %p2100_p13 }
  0x6e   : > { %p2103_p2 = pnand %p2102_p12, %p2096_p5 }
  0x70   : > { %2106 = shalt.err (!%p2103_p2)
}
  0x71   : > { %s2107_s22 = scalar_lea.vmem %s2449_s12, 128  ;;  %s2201_s24 = smov [#allocation2]  }
  0x72   : > { %p2108_p1 = scmp.ne.s32.totalorder %s2449_s12, %s2107_s22  ;;  %s2112_s23 = sshll.u32 %s2201_s24, 4  ;;  %s2113_s23 = int_to_ptr.vmem [resolvable:$false] %s2112_s23 }
  0x73   : > { %s2114_s18 = scalar_lea.vmem %s2113_s23, 256  ;;  %p2115_p3 = scmp.lt.s32.totalorder %s2449_s12, %s2113_s23 }
  0x74   : > { %p2110_p4 = pnand %p2108_p1, %p2094_p0  ;;  %p2116_p7 = scmp.lt.s32.totalorder %s2114_s18, %s2107_s22 }
  0x76   : > { %p2111_p8 = pneg %p2110_p4  ;;  %p2117_p10 = por %p2116_p7, %p2115_p3 }
  0x78   : > { %p2118_p13 = pnand %p2117_p10, %p2111_p8 }
  0x7a   : > { %2121 = shalt.err (!%p2118_p13)
}
  0x7b   : > { %1923 = dma.hbm_to_vmem [thread:$0]  (!%p2445_p11), %s2443_s20, 128, %s2449_s12, %s414_s21  }
  0x7c   : > { %p2747_p5 = scmp.ne.s32.totalorder %s2740_s16, 0 }
  0x7d   : > { %s2479_s30 = sand.u32 (!%p2747_p5), 1, %s2188_s26   ;;  %p2748_p0 = scmp.ne.s32.totalorder (!%p2747_p5), %s2737_s14, 0 }
  0x7e   : > { %433 = sbr.rel (%p2747_p5) target bundleno = 2688 (0xa80), region = 72  ;;  %s1699_s25 = sshll.u32 (!%p2747_p5), %s2479_s30, 3 }
  0x7f   : > { %s436_s11 = scalar_lea.sflag (!%p2747_p5), [#allocation3], %s2479_s30  ;;  %s439_s22 = scalar_lea.vmem (!%p2747_p5), [#allocation2], %s1699_s25 }
  0x85   : > { %2167 = dma.done.wait (%p2748_p0), %s436_s11, 128  }
  0x86   : > { %2169 = vsyncadd (%p2748_p0), %s436_s11, 4294967168  ;;  %p2749_p11 = scmp.eq.s32.totalorder %s2311_s29, 0 }
  0x88   : > { %2171 = dma.done.wait (%p2749_p11), [#allocation6], 32   ;;  %p2750_p9 = pmov %p2749_p11 }
  0x8a   : > { %2173 = vsyncadd (%p2750_p9), [#allocation6], 4294967264  ;;  %p2751_p12 = pmov %p2750_p9 }
  0x8b   : > { %p2752_p2 = pmov %p2750_p9 }
  0x8c   : > { %2175 = dma.done.wait (%p2751_p12), [#allocation9], 16  }
  0x8d   : > { %2177 = vsyncadd (%p2752_p2), [#allocation9], 4294967280  ;;  %v2202_v0 = vmov 0.0|0.0   ;;  %vm2203_vm0 = vmmov 0   ;;  %v2204_v1 = vmov 0.0   ;;  %s2753_s1 = sld [smem:[#allocation18_spill]] }
  0x8e   : > { %1864 = vmatprep.subr.bf16.mxu1 %v2202_v0  ;;  %1780 = vmatprep.mubr.msk.f32.mxu1 %vm2203_vm0, %v2204_v1  ;;  %v2516_v8 = vld [vmem:[%s439_s22] sm:$0xff]  ;;  %vm506_vm1 = vcmask 261120   ;;  %s2205_s14 = smov 120   ;;  %s2206_s22 = smov 96   ;;  %vm583_vm2 = vcmask 64512   ;;  %vm1253_vm3 = vcmask 130048  }
  0x8f   : > { %1793 = vmatprep.subr.mxu0 %v2204_v1  ;;  %1795 = vmatprep.mubr.msk.f32.mxu0 %vm2203_vm0, %v2204_v1  ;;  %v1704_v9 = vld [vmem:[%s2713_s2] ss:$0 sm:$0xff]  ;;  %s2207_s16 = smov 80   ;;  %s2208_s20 = smov 88   ;;  %vm1255_vm4 = vcmask 195584   ;;  %vm1472_vm5 = vcmask 523264  }
  0x90   : > { %s2209_s12 = smov 72   ;;  %s2210_s15 = smov 112  }
  0x91   : > { %s2211_s21 = smov 104   ;;  %s2212_s24 = smov 56  }
  0x92   : > { %s2213_s23 = smov 64   ;;  %s2214_s18 = smov 48  }
  0x93   : > { %v495_v2 = vld [vmem:[%s2753_s1] sm:$0xff]  ;;  %v496_v3 = vld [vmem:[%s2753_s1 + $0x8] sm:$0xff]  ;;  %v497_v4 = vld [vmem:[%s2753_s1 + $0x10] sm:$0xff]  ;;  %s2215_s11 = smov 40   ;;  %s2756_s0 = sld [smem:[#allocation21_spill]] }
  0x94   : > { %v1865_v5 = vpack.c.bf16 %v496_v3, %v495_v2  ;;  %v498_v6 = vld [vmem:[%s2753_s1 + $0x18] sm:$0xff] }
  0x95   : > { %v1868_v7 = vpack.c.bf16 %v498_v6, %v497_v4  ;;  %v1257_v6 = vld [vmem:[%s2714_s3] sm:$0xff] }
  0x96   : > { %1866 = vmatpush3.bf16.msra.mxu1 %v1865_v5 }
  0x97   : > { %1867 = vmatprep.subr.bf16.mxu1 %v2202_v0 }
  0x9a   : > { %1869 = vmatpush3.bf16.msra.mxu1 %v1868_v7  ;;  %v1258_v7 = vld [vmem:[%s2714_s3 + $0x8] sm:$0xff] }
  0x9b   : > { %1783 = vmatprep.subr.mxu1 %v2204_v1 }
  0x9d   : > { %1781 = vmatmul.mubr.msk.f32.vlgmr.msra.gmra.mrb[0].mxu1 %vm506_vm1, %v2516_v8 }
  0x9e   : > { %1785 = vmatprep.mubr.msk.f32.mxu1 %vm2203_vm0, %v2204_v1 }
 0x170   : > { %v576_v10 = vpop.f32.mrb[0].mxu1 }
 0x171   : > { %v2526_v11 = vadd.f32 %v1704_v9, %v576_v10  ;;  %v1782_v12 = vpop.f32.mrb[1].mxu1  ;;  %v1871_v9 = vpack.c.bf16 %v1258_v7, %v1257_v6 }
 0x173   : > { %745 = vrot.lane.b32.xlu1 %v2526_v11, %s2205_s14  ;;  %581 = vrot.lane.b32.xlu0 %v2526_v11, %s2206_s22  ;;  %s2755_s14 = sld [smem:[#allocation20_spill]]  ;;  %s1729_s22 = sshll.u32 %s2311_s29, 7 }
 0x174   : > { %s2666_s1 = scalar_lea.hbm %s2756_s0, %s1729_s22  ;;  %s2219_s29 = smov [#allocation10]  }
 0x177   : > { %912 = vrot.lane.b32.xlu1 %v2526_v11, %s2207_s16  ;;  %747 = vrot.lane.b32.xlu0 %v2526_v11, %s2208_s20  ;;  %s493_s16 = scalar_lea.vmem [#allocation10], %s1699_s25  ;;  %s2126_s25 = sshll.u32 %s2219_s29, 4  ;;  %s2127_s25 = int_to_ptr.vmem [resolvable:$false] %s2126_s25 }
 0x178   : > { %s1591_s20 = sshll.u32 %s493_s16, 4  ;;  %s2668_s20 = int_to_ptr.vmem [resolvable:$true] %s1591_s20 }
 0x179   : > { %p2129_p3 = scmp.lt.s32.totalorder %s2668_s20, %s2127_s25 }
 0x17b   : > { %1077 = vrot.lane.b32.xlu1 %v2526_v11, %s2209_s12  ;;  %910 = vrot.lane.b32.xlu0 %v2526_v11, %s2210_s15  ;;  %s2216_s12 = smov 8  }
 0x17f   : > { %1075 = vrot.lane.b32.xlu0 %v2526_v11, %s2211_s21  ;;  %s1578_s21 = scalar_lea.sflag [#allocation4], %s2479_s30 }
 0x1e5   : > { %v746_v13 = vpop.permute.xlu1 %745  ;;  %v582_v14 = vpop.permute.xlu0 %581 }
 0x1e6   : > { %1784 = vmatpush3.xpose.msk.msra.mxu1 %vm583_vm2, %v582_v14  ;;  %v1259_v14 = vld [vmem:[%s2714_s3 + $0x10] sm:$0xff] }
 0x1e7   : > { %1788 = vmatprep.subr.mxu1 %v2204_v1 }
 0x1e9   : > { %1786 = vmatmul.mubr.msk.f32.vlgmr.msra.gmra.mrb[2].mxu1 %vm583_vm2, %v2526_v11  ;;  %v748_v15 = vpop.permute.xlu0 %747  ;;  %v913_v16 = vpop.permute.xlu1 %912 }
 0x1ea   : > { %1794 = vmatpush3.xpose.msk.msra.mxu0 %vm583_vm2, %v748_v15  ;;  %1790 = vmatprep.mubr.msk.f32.mxu1 %vm2203_vm0, %v2204_v1  ;;  %v1260_v15 = vld [vmem:[%s2714_s3 + $0x18] sm:$0xff] }
 0x1eb   : > { %1803 = vmatprep.subr.mxu0 %v2204_v1 }
 0x1ed   : > { %1796 = vmatmul.mubr.msk.f32.vlgmr.msra.gmra.mrb[0].mxu0 %vm583_vm2, %v746_v13  ;;  %v911_v17 = vpop.permute.xlu0 %910  ;;  %v1078_v18 = vpop.permute.xlu1 %1077 }
 0x1ee   : > { %1804 = vmatpush3.xpose.msk.msra.mxu0 %vm583_vm2, %v913_v16  ;;  %1805 = vmatprep.mubr.msk.f32.mxu0 %vm2203_vm0, %v2204_v1  ;;  %v1874_v16 = vpack.c.bf16 %v1260_v15, %v1259_v14 }
 0x1ef   : > { %1813 = vmatprep.subr.mxu0 %v2204_v1 }
 0x1f1   : > { %1806 = vmatmul.mubr.msk.f32.vlgmr.msra.gmra.mrb[2].mxu0 %vm583_vm2, %v911_v17  ;;  %v1076_v19 = vpop.permute.xlu0 %1075 }
 0x1f2   : > { %1814 = vmatpush3.xpose.msk.msra.mxu0 %vm583_vm2, %v1078_v18  ;;  %1815 = vmatprep.mubr.msk.f32.mxu0 %vm2203_vm0, %v2204_v1 }
 0x1f3   : > { %1870 = vmatprep.subr.bf16.mxu0 %v2202_v0 }
 0x1f5   : > { %1816 = vmatmul.mubr.msk.f32.vlgmr.msra.gmra.mrb[4].mxu0 %vm583_vm2, %v1076_v19 }
 0x1f6   : > { %1831 = vmatprep.mubr.msk.f32.mxu0 %vm2203_vm0, %v2204_v1  ;;  %1872 = vmatpush3.bf16.msra.mxu0 %v1871_v9 }
 0x1f7   : > { %1873 = vmatprep.subr.bf16.mxu0 %v2202_v0 }
 0x1fa   : > { %1875 = vmatpush3.bf16.msra.mxu0 %v1874_v16 }
 0x1fb   : > { %1882 = vmatprep.subr.bf16.mxu0 %v2202_v0 }
 0x2bc   : > { %v654_v20 = vpop.f32.mrb[2].mxu1 }
 0x2bd   : > { %v1787_v21 = vpop.f32.mrb[3].mxu1  ;;  %v658_v22 = vsel %vm583_vm2, %v654_v20, -inf }
 0x2be   : > { %659 = vmax.xlane.f32.xlu1 %v658_v22 }
 0x2c0   : > { %v819_v23 = vpop.f32.mrb[0].mxu0 }
 0x2c1   : > { %v1797_v24 = vpop.f32.mrb[1].mxu0  ;;  %v823_v25 = vsel %vm583_vm2, %v819_v23, -inf }
 0x2c2   : > { %824 = vmax.xlane.f32.xlu0 %v823_v25 }
 0x2c4   : > { %v984_v26 = vpop.f32.mrb[2].mxu0 }
 0x2c5   : > { %v1807_v27 = vpop.f32.mrb[3].mxu0  ;;  %v988_v28 = vsel %vm583_vm2, %v984_v26, -inf }
 0x2c6   : > { %989 = vmax.xlane.f32.xlu0 %v988_v28  ;;  %v1718_v27 = vld [vmem:[%s2715_s4] ss:$0 sm:$0xff] }
 0x2c8   : > { %v1149_v29 = vpop.f32.mrb[4].mxu0 }
 0x2c9   : > { %v1817_v30 = vpop.f32.mrb[5].mxu0  ;;  %v1153_v31 = vsel %vm583_vm2, %v1149_v29, -inf }
 0x2ca   : > { %1154 = vmax.xlane.f32.xlu1 %v1153_v31 }
 0x2db   : > { %834 = vrot.lane.b32.xlu1 %v2526_v11, %s2212_s24  ;;  %s2122_s24 = scalar_lea.vmem %s2668_s20, 128 }
 0x2dc   : > { %p2123_p1 = scmp.ne.s32.totalorder %s2668_s20, %s2122_s24 }
 0x2de   : > { %p2124_p4 = pnand %p2123_p1, %p2434_p6 }
 0x2e0   : > { %p2125_p8 = pneg %p2124_p4 }
 0x34b   : > { %v660_v32 = vpop.xlane.xlu1 %659 }
 0x34c   : > { %v661_v33 = vsub.f32 %v654_v20, %v660_v32 }
 0x34e   : > { %v662_v34 = vmul.f32 1.442695, %v661_v33 }
 0x34f   : > { %v825_v35 = vpop.xlane.xlu0 %824 }
 0x350   : > { %1988 = vpow2.f32 %v662_v34  ;;  %v826_v36 = vsub.f32 %v819_v23, %v825_v35 }
 0x352   : > { %v827_v37 = vmul.f32 1.442695, %v826_v36 }
 0x353   : > { %v990_v47 = vpop.xlane.xlu0 %989 }
 0x354   : > { %1990 = vpow2.f32 %v827_v37  ;;  %v991_v48 = vsub.f32 %v984_v26, %v990_v47 }
 0x356   : > { %v992_v49 = vmul.f32 1.442695, %v991_v48  ;;  %v1461_v48 = vld [vmem:[%s2720_s9 + $0x20] sm:$0xff] }
 0x357   : > { %v1155_v38 = vpop.xlane.xlu1 %1154 }
 0x358   : > { %v1156_v39 = vsub.f32 %v1149_v29, %v1155_v38  ;;  %v1373_v38 = vld [vmem:[%s2718_s7 + $0x8] sm:$0xff] }
 0x35a   : > { %v1989_v40 = vpop.eup %1988  ;;  %v1157_v41 = vmul.f32 1.442695, %v1156_v39 }
 0x35b   : > { %v664_v42 = vsel %vm583_vm2, %v1989_v40, 0.0  ;;  %v835_v52 = vpop.permute.xlu1 %834 }
 0x35c   : > { %1992 = vpow2.f32 %v1157_v41  ;;  %665 = vadd.xlane.f32.xlu0 %v664_v42  ;;  %v1457_v42 = vld [vmem:[%s2720_s9] sm:$0xff] }
 0x35d   : > { %1994 = vpow2.f32 %v992_v49  ;;  %v1462_v49 = vld [vmem:[%s2720_s9 + $0x28] sm:$0xff] }
 0x35e   : > { %v1991_v43 = vpop.eup %1990 }
 0x35f   : > { %v829_v44 = vsel %vm583_vm2, %v1991_v43, 0.0 }
 0x360   : > { %830 = vadd.xlane.f32.xlu1 %v829_v44  ;;  %v1459_v44 = vld [vmem:[%s2720_s9 + $0x10] sm:$0xff] }
 0x366   : > { %v1993_v45 = vpop.eup %1992 }
 0x367   : > { %v1159_v46 = vsel %vm583_vm2, %v1993_v45, 0.0  ;;  %v1995_v50 = vpop.eup %1994 }
 0x368   : > { %1160 = vadd.xlane.f32.xlu1 %v1159_v46  ;;  %v994_v51 = vsel %vm583_vm2, %v1995_v50, 0.0  ;;  %v1460_v46 = vld [vmem:[%s2720_s9 + $0x18] sm:$0xff] }
 0x369   : > { %v1886_v47 = vpack.c.bf16 %v1460_v46, %v1459_v44 }
 0x372   : > { %669 = vrot.lane.b32.xlu0 %v2526_v11, %s2213_s23  ;;  %s2754_s23 = sld [smem:[#allocation19_spill]] }
 0x379   : > { %999 = vrot.lane.b32.xlu1 %v2526_v11, %s2214_s18  ;;  %s2217_s18 = smov 16  }
 0x391   : > { %995 = vadd.xlane.f32.xlu0 %v994_v51 }
 0x3a7   : > { %1164 = vrot.lane.b32.xlu0 %v2526_v11, %s2215_s11  ;;  %s2218_s11 = smov 24  }
 0x3e9   : > { %v666_v53 = vpop.xlane.xlu0 %665 }
 0x3ea   : > { %1996 = vrcp.f32 %v666_v53 }
 0x3ed   : > { %v670_v54 = vpop.permute.xlu0 %669  ;;  %v831_v55 = vpop.xlane.xlu1 %830 }
 0x3ee   : > { %1998 = vrcp.f32 %v831_v55  ;;  %1789 = vmatpush3.msra.mxu1 %v670_v54  ;;  %v1720_v55 = vld [vmem:[#allocation5] ss:$0 sm:$0xff] }
 0x3ef   : > { %1798 = vmatprep.subr.mxu1 %v2204_v1 }
 0x3f4   : > { %v1997_v56 = vpop.eup %1996 }
 0x3f5   : > { %v668_v57 = vmul.f32 %v1997_v56, %v1989_v40  ;;  %v1161_v58 = vpop.xlane.xlu1 %1160  ;;  %v1375_v40 = vld [vmem:[%s2718_s7 + $0x18] sm:$0xff] }
 0x3f7   : > { %1791 = vmatmul.mubr.msk.f32.vlgmr.msra.gmra.mrb[4].mxu1 %vm583_vm2, %v668_v57  ;;  %v1721_v57 = vld [vmem:[#allocation7] ss:$0 sm:$0xff] }
 0x3f8   : > { %v1999_v59 = vpop.eup %1998  ;;  %1799 = vmatpush3.msra.mxu1 %v835_v52  ;;  %1800 = vmatprep.mubr.msk.f32.mxu1 %vm2203_vm0, %v2204_v1 }
 0x3f9   : > { %v833_v60 = vmul.f32 %v1999_v59, %v1991_v43  ;;  %v1000_v61 = vpop.permute.xlu1 %999  ;;  %1808 = vmatprep.subr.mxu1 %v2204_v1  ;;  %v1458_v43 = vld [vmem:[%s2720_s9 + $0x8] sm:$0xff] }
 0x3fb   : > { %1801 = vmatmul.mubr.msk.f32.vlgmr.msra.gmra.mrb[6].mxu1 %vm583_vm2, %v833_v60  ;;  %v1463_v60 = vld [vmem:[%s2720_s9 + $0x30] sm:$0xff] }
 0x3fc   : > { %1809 = vmatpush3.msra.mxu1 %v1000_v61  ;;  %1810 = vmatprep.mubr.msk.f32.mxu1 %vm2203_vm0, %v2204_v1 }
 0x3fd   : > { %1818 = vmatprep.subr.mxu1 %v2204_v1 }
 0x41e   : > { %v996_v62 = vpop.xlane.xlu0 %995 }
 0x41f   : > { %2000 = vrcp.f32 %v996_v62  ;;  %v1722_v62 = vld [vmem:[#allocation8] ss:$0 sm:$0xff] }
 0x420   : > { %2002 = vrcp.f32 %v1161_v58 }
 0x422   : > { %v1165_v4 = vpop.permute.xlu0 %1164 }
 0x429   : > { %v2001_v63 = vpop.eup %2000 }
 0x42a   : > { %v998_v2 = vmul.f32 %v2001_v63, %v1995_v50  ;;  %v2003_v3 = vpop.eup %2002  ;;  %v1889_v50 = vpack.c.bf16 %v1462_v49, %v1461_v48 }
 0x42b   : > { %v1163_v5 = vmul.f32 %v2003_v3, %v1993_v45  ;;  %v1883_v45 = vpack.c.bf16 %v1458_v43, %v1457_v42 }
 0x42c   : > { %1811 = vmatmul.mubr.msk.f32.vlgmr.msra.gmra.mrb[8].mxu1 %vm583_vm2, %v998_v2 }
 0x42d   : > { %1819 = vmatpush3.msra.mxu1 %v1165_v4  ;;  %1820 = vmatprep.mubr.msk.f32.mxu1 %vm2203_vm0, %v2204_v1 }
 0x42e   : > { %1876 = vmatprep.subr.bf16.mxu1 %v2202_v0 }
 0x430   : > { %1821 = vmatmul.mubr.msk.f32.vlgmr.msra.gmra.mrb[10].mxu1 %vm583_vm2, %v1163_v5  ;;  %v1724_v5 = vld [vmem:[%s2721_s10] ss:$0 sm:$0xff] }
 0x431   : > { %1842 = vmatprep.mubr.msk.f32.mxu1 %vm2203_vm0, %v2204_v1 }
 0x4ca   : > { %v741_v10 = vpop.f32.mrb[4].mxu1 }
 0x4cb   : > { %v1792_v11 = vpop.f32.mrb[5].mxu1 }
 0x4ce   : > { %v906_v12 = vpop.f32.mrb[6].mxu1 }
 0x4cf   : > { %1241 = vrot.lane.b32.xlu1 %v906_v12, %s2216_s12  ;;  %v1802_v13 = vpop.f32.mrb[7].mxu1 }
 0x4ff   : > { %v1071_v17 = vpop.f32.mrb[8].mxu1 }
 0x500   : > { %1245 = vrot.lane.b32.xlu0 %v1071_v17, %s2217_s18  ;;  %v1812_v18 = vpop.f32.mrb[9].mxu1 }
 0x503   : > { %v1236_v19 = vpop.f32.mrb[10].mxu1 }
 0x504   : > { %1249 = vrot.lane.b32.xlu1 %v1236_v19, %s2218_s11  ;;  %v1822_v20 = vpop.f32.mrb[11].mxu1 }
 0x541   : > { %v1242_v21 = vpop.permute.xlu1 %1241 }
 0x542   : > { %v1252_v23 = vsel %vm583_vm2, %v741_v10, %v1242_v21  ;;  %v1726_v21 = vld [vmem:[%s2754_s23] ss:$0 sm:$0xff]  ;;  %s2128_s23 = scalar_lea.vmem %s2127_s25, 256 }
 0x543   : > { %p2130_p7 = scmp.lt.s32.totalorder %s2128_s23, %s2122_s24 }
 0x545   : > { %p2131_p10 = por %p2130_p7, %p2129_p3 }
 0x547   : > { %p2132_p13 = pnand %p2131_p10, %p2125_p8 }
 0x572   : > { %v1246_v22 = vpop.permute.xlu0 %1245 }
 0x573   : > { %v1254_v24 = vsel %vm1253_vm3, %v1252_v23, %v1246_v22  ;;  %v1727_v23 = vld [vmem:[%s2755_s14] ss:$0 sm:$0xff] }
 0x576   : > { %v1250_v25 = vpop.permute.xlu1 %1249 }
 0x577   : > { %v1256_v26 = vsel %vm1255_vm4, %v1254_v24, %v1250_v25 }
 0x578   : > { %1832 = vmatmul.mubr.msk.f32.vlgmr.msra.gmra.mrb[6].mxu0 %vm506_vm1, %v1256_v26 }
 0x579   : > { %1861 = vmatprep.mubr.msk.f32.mxu0 %vm2203_vm0, %v2204_v1  ;;  %v1372_v1 = vld [vmem:[%s2718_s7] sm:$0xff]  ;;  %1884 = vmatpush3.bf16.msra.mxu0 %v1883_v45 }
 0x57a   : > { %v1877_v39 = vpack.c.bf16 %v1373_v38, %v1372_v1  ;;  %1885 = vmatprep.subr.bf16.mxu0 %v2202_v0 }
 0x57c   : > { %1878 = vmatpush3.bf16.msra.mxu1 %v1877_v39 }
 0x57d   : > { %1879 = vmatprep.subr.bf16.mxu1 %v2202_v0  ;;  %1887 = vmatpush3.bf16.msra.mxu0 %v1886_v47 }
 0x57e   : > { %1888 = vmatprep.subr.bf16.mxu0 %v2202_v0 }
 0x581   : > { %1890 = vmatpush3.bf16.msra.mxu0 %v1889_v50 }
 0x582   : > { %1891 = vmatprep.subr.bf16.mxu0 %v2202_v0  ;;  %v1464_v0 = vld [vmem:[%s2720_s9 + $0x38] sm:$0xff] }
 0x583   : > { %v1892_v61 = vpack.c.bf16 %v1464_v0, %v1463_v60 }
 0x585   : > { %1893 = vmatpush3.bf16.msra.mxu0 %v1892_v61 }
 0x64b   : > { %v1337_v28 = vpop.f32.mrb[6].mxu0 }
 0x64c   : > { %v1338_v29 = vadd.f32 %v1718_v27, %v1337_v28  ;;  %v1833_v30 = vpop.f32.mrb[7].mxu0 }
 0x64e   : > { %v1341_v31 = vadd.f32 %v1338_v29, %v2516_v8  ;;  %v1374_v8 = vld [vmem:[%s2718_s7 + $0x10] sm:$0xff] }
 0x64f   : > { %v1880_v41 = vpack.c.bf16 %v1375_v40, %v1374_v8 }
 0x650   : > { %v1344_v32 = vsel %vm506_vm1, %v1341_v31, 0.0 }
 0x651   : > { %1345 = vadd.xlane.f32.xlu0 %v1344_v32  ;;  %1881 = vmatpush3.bf16.msra.mxu1 %v1880_v41 }
 0x6de   : > { %v1346_v33 = vpop.xlane.xlu0 %1345 }
 0x6df   : > { %v1348_v34 = vmul.f32 0.03125, %v1346_v33 }
 0x6e1   : > { %v1349_v35 = vsub.f32 %v1341_v31, %v1348_v34 }
 0x6e3   : > { %v1350_v36 = vmul.f32 %v1349_v35, %v1349_v35 }
 0x6e5   : > { %v1351_v37 = vsel %vm506_vm1, %v1350_v36, 0.0 }
 0x6e6   : > { %1352 = vadd.xlane.f32.xlu1 %v1351_v37 }
 0x773   : > { %v1353_v51 = vpop.xlane.xlu1 %1352 }
 0x774   : > { %v1354_v52 = vmul.f32 0.03125, %v1353_v51 }
 0x776   : > { %v1355_v53 = vadd.f32 1e-05, %v1354_v52 }
 0x778   : > { %2004 = vrsqrt.f32 %v1355_v53 }
 0x782   : > { %v2005_v54 = vpop.eup %2004 }
 0x783   : > { %v1357_v56 = vmul.f32 %v2005_v54, %v1349_v35 }
 0x785   : > { %v1364_v58 = vmul.f32 %v1720_v55, %v1357_v56 }
 0x787   : > { %v1371_v59 = vadd.f32 %v1721_v57, %v1364_v58 }
 0x789   : > { %1843 = vmatmul.mubr.msk.f32.vlgmr.msra.gmra.mrb[12].mxu1 %vm506_vm1, %v1371_v59 }
 0x85c   : > { %v1452_v63 = vpop.f32.mrb[12].mxu1 }
 0x85d   : > { %v1453_v2 = vadd.f32 %v1722_v62, %v1452_v63  ;;  %v1844_v3 = vpop.f32.mrb[13].mxu1 }
 0x85f   : > { %v1456_v4 = vmax.f32 %v1453_v2, 0.0 }
 0x861   : > { %1862 = vmatmul.mubr.msk.f32.vlgmr.msra.gmra.mrb[8].mxu0 %vm1472_vm5, %v1456_v4 }
 0x934   : > { %v1542_v6 = vpop.f32.mrb[8].mxu0 }
 0x935   : > { %v1543_v7 = vadd.f32 %v1724_v5, %v1542_v6  ;;  %v1863_v9 = vpop.f32.mrb[9].mxu0 }
 0x937   : > { %v1546_v10 = vadd.f32 %v1543_v7, %v1371_v59 }
 0x939   : > { %v1549_v11 = vsel %vm506_vm1, %v1546_v10, 0.0 }
 0x93a   : > { %1550 = vadd.xlane.f32.xlu0 %v1549_v11 }
 0x9c7   : > { %v1551_v12 = vpop.xlane.xlu0 %1550 }
 0x9c8   : > { %v1552_v13 = vmul.f32 0.03125, %v1551_v12 }
 0x9ca   : > { %v1553_v14 = vsub.f32 %v1546_v10, %v1552_v13 }
 0x9cc   : > { %v1554_v15 = vmul.f32 %v1553_v14, %v1553_v14 }
 0x9ce   : > { %v1555_v16 = vsel %vm506_vm1, %v1554_v15, 0.0 }
 0x9cf   : > { %1556 = vadd.xlane.f32.xlu0 %v1555_v16 }
 0xa5c   : > { %v1557_v17 = vpop.xlane.xlu0 %1556 }
 0xa5d   : > { %v1558_v18 = vmul.f32 0.03125, %v1557_v17 }
 0xa5f   : > { %v1559_v19 = vadd.f32 1e-05, %v1558_v18 }
 0xa61   : > { %2006 = vrsqrt.f32 %v1559_v19 }
 0xa6b   : > { %v2007_v20 = vpop.eup %2006 }
 0xa6c   : > { %v1561_v22 = vmul.f32 %v2007_v20, %v1553_v14 }
 0xa6e   : > { %v1568_v24 = vmul.f32 %v1726_v21, %v1561_v22 }
 0xa70   : > { %v1575_v25 = vadd.f32 %v1727_v23, %v1568_v24 }
 0xa72   : > { %1576 = vst.msk [vmem:[%s493_s16] sm:$0xff] %vm506_vm1, %v1575_v25 }
 0xa73   : > { %2135 = shalt.err (!%p2132_p13)
}
 0xa74   : > { %s2136_s30 = scalar_lea.hbm %s2666_s1, 128  ;;  %s2140_s14 = scalar_lea.hbm %s2756_s0, 256 }
 0xa75   : > { %p2137_p5 = scmp.ne.s32.totalorder %s2666_s1, %s2136_s30  ;;  %p2141_p9 = scmp.lt.u32.totalorder %s2666_s1, %s2756_s0 }
 0xa76   : > { %p2142_p12 = scmp.lt.u32.totalorder %s2140_s14, %s2136_s30  ;;  %p2144_p1 = scmp.lt.u32.totalorder %s2136_s30, %s2666_s1 }
 0xa77   : > { %p2138_p0 = pnand %p2137_p5, %p2434_p6 }
 0xa78   : > { %p2143_p2 = por %p2142_p12, %p2141_p9 }
 0xa79   : > { %p2139_p11 = pneg %p2138_p0 }
 0xa7a   : > { %p2145_p4 = por %p2144_p1, %p2143_p2 }
 0xa7c   : > { %p2146_p8 = pnand %p2145_p4, %p2139_p11 }
 0xa7e   : > { %2149 = shalt.err (!%p2146_p8)
}
 0xa7f   : > { %1908 = dma.vmem_to_hbm [thread:$0]  (%p2434_p6), %s2668_s20, 128, %s2666_s1, %s1578_s21  }
 0xa80 PF: > { %s2757_s12 = sld [smem:[#allocation15_spill]]  ;;  %s2758_s15 = sld [smem:[#allocation16_spill]] }
 0xa81   : > { %p2760_p7 = scmp.ge.s32.totalorder %s2196_s28, 2 }
 0xa86   : > { %s1603_s24 = sand.u32 1, %s2757_s12   ;;  %p2759_p3 = scmp.ne.s32.totalorder %s2758_s15, 0 }
 0xa87   : > { %s1604_s29 = scalar_lea.sflag [#allocation4], %s1603_s24 }
 0xa88   : > { %p1925_p10 = pnand %p2760_p7, %p2759_p3 }
 0xa8a   : > { %2179 = dma.done.wait (!%p1925_p10), %s1604_s29, 128  }
 0xa8b   : > { %2181 = vsyncadd (!%p1925_p10), %s1604_s29, 4294967168  ;;  %p28_p13 = scmp.ge.s32.totalorder %s2420_s19, 4   ;;  %s2761_s25 = smov %s2188_s26 }
 0xa8c   : > { %s2762_s26 = smov %s2192_s27  ;;  %s2763_s27 = smov %s2430_s13 }
 0xa8d   : > { %s2764_s28 = smov %s2420_s19  ;;  %30 = sbr.rel (!%p28_p13) target bundleno = 13 (0xd), region = 129 }
 0xa94   :  { %1609 = vsyncpa [#allocation3], 1 }
 0xa95   :  { %1611 = vsyncpa [#allocation3 + $0x1], 1 }
 0xa96   :  { %1612 = vsyncpa [#allocation6], 1 }
 0xa97   :  { %1613 = vsyncpa [#allocation9], 1 }
 0xa98   :  { %1614 = vsyncpa [#allocation4], 1 }
 0xa99   :  { %1616 = vsyncpa [#allocation4 + $0x1], 1 }

</bundles_post_ra>
